<compile_context>
chip_gen: v7x
topology: tpu7x:2x2x1
jax: 0.10.0
libtpu: 0.0.40
codegen_flags: <defaults>
</compile_context>

<pallas_src>
import functools
import math

import jax
import jax.numpy as jnp
import numpy as np
from jax import lax
from jax.experimental import pallas as pl
from jax.experimental.pallas import tpu as pltpu

NEG_INF = -100000.0  # matches torch INF = tensor(100000).float()


# ----------------------------------------------------------------------------
# Hardware introspection / tile sizing
# ----------------------------------------------------------------------------
def _tpu_kind():
    try:
        return jax.devices()[0].device_kind.lower()
    except Exception:
        return ""


def _vmem_capacity_bytes(kind):
    try:
        cap = getattr(pltpu.get_tpu_info(), "vmem_capacity_bytes", None)
        if cap:
            return int(cap)
    except Exception:
        pass
    if "7" in kind:                      # v7x: 64 MiB per TensorCore
        return 64 * 1024 * 1024
    return 128 * 1024 * 1024             # v5e / v6e


def _estimate_vmem_bytes(tq, S, Dp, attn_bytes):
    # Pallas double-buffers every BlockSpec-managed operand by default.
    kv = 2 * 2 * (S * Dp * 2)                        # kp + v, bf16, x2 buffers
    wgt = 2 * (Dp * Dp * 2 + Dp * 4)                 # Wq^T bf16 + bq f32
    q_in = 2 * (tq * Dp * 2 + tq * 4)                # q tile bf16 + mask i32
    outs = 2 * (tq * Dp * 4 + tq * S * attn_bytes)   # ctx f32 + attn
    tmps = 4 * tq * S * 4                            # score/e/attn live temps (slack)
    return kv + wgt + q_in + outs + tmps


def _pick_q_tile(S, Dp, attn_bytes, vmem_budget, is_v7x):
    # Generation-aware caps (v7x has half the VMEM of v5e/v6e).
    if is_v7x:
        cands = (256, 128) if S < 4096 else (128,)
    else:
        cands = (512, 256, 128)
    divisible = [t for t in cands if t <= S and S % t == 0]
    for t in divisible:                               # largest first
        if _estimate_vmem_bytes(t, S, Dp, attn_bytes) <= vmem_budget:
            return t
    if divisible:
        return divisible[-1]
    # Small / odd sequence lengths: one full-sequence tile (block == full dim).
    # TODO(synk): very large S that is not a multiple of 128 would need a
    # padded key-bias path to tile; not required for this parity target.
    return S


# ----------------------------------------------------------------------------
# Kernel
# ----------------------------------------------------------------------------
def _sdpa_kernel(q_ref, kp_ref, v_ref, mask_ref, wq_ref, bq_ref,
                 ctx_ref, attn_ref, *, exp_dtype):
    """One (batch, q-tile) grid step.

    q_ref    (1, TQ, Dp) bf16   query tile
    kp_ref   (1, S,  Dp) bf16   pre-projected keys (batch-resident)
    v_ref    (1, S,  Dp) bf16   values (batch-resident)
    mask_ref (1, TQ, 1)  int32  per-query-row keep mask
    wq_ref   (Dp, Dp)    bf16   Wq^T with 1/sqrt(D) pre-folded
    bq_ref   (1, Dp)     f32    bq * 1/sqrt(D)
    ctx_ref  (1, TQ, Dp) f32    context output tile
    attn_ref (1, TQ, S)  bf16/f32  attention output tile
    """
    # Q projection, fused per tile; the 1/sqrt(D) scale is folded into wq/bq.
    qp = lax.dot_general(
        q_ref[0], wq_ref[...],
        dimension_numbers=(((1,), (0,)), ((), ())),
        preferred_element_type=jnp.float32) + bq_ref[...]

    # Scores (TQ, S): NT-form dot (contract dim 1 of both) — kp stays
    # stationary on the MXU, no kp.T materialization (same form as the
    # canonical flash-attention q·k^T einsum).
    score = lax.dot_general(
        qp.astype(jnp.bfloat16), kp_ref[0],
        dimension_numbers=(((1,), (1,)), ((), ())),
        preferred_element_type=jnp.float32)

    # Row-wise mask (broadcast over keys) — exactly like the torch module's
    # masked_fill.  NOTE: an additive bias is NOT equivalent here because
    # softmax is shift-invariant per row; masked rows must be *filled*.
    score = jnp.where(mask_ref[0] != 0, score, NEG_INF)

    # Numerically stable softmax over keys.  exp runs in bf16 on v6e/v7x
    # (EUP throughput, vreg pressure), f32 on v5e; denom accumulates in f32.
    smax = jnp.max(score, axis=-1, keepdims=True)
    e = jnp.exp((score - smax).astype(exp_dtype))
    denom = jnp.sum(e.astype(jnp.float32), axis=-1, keepdims=True)
    inv = pl.reciprocal(denom, approx=False)       # exact: rows sum to 1
    attn = e * inv.astype(e.dtype)

    # Context = attn @ V: bf16 operands, f32 accumulation on the MXU.
    ctx = lax.dot_general(
        attn.astype(jnp.bfloat16), v_ref[0],
        dimension_numbers=(((1,), (0,)), ((), ())),
        preferred_element_type=jnp.float32)

    ctx_ref[0] = ctx.astype(ctx_ref.dtype)
    attn_ref[0] = attn.astype(attn_ref.dtype)


# ----------------------------------------------------------------------------
# Wrapper
# ----------------------------------------------------------------------------
def scaled_dot_product_attention(query, key, value, mask, wq, bq, wk, bk,
                                 *, attn_dtype=jnp.bfloat16, q_tile=None):
    """query/key/value: (B, S, D) f32; mask: (B, S) bool/int (nonzero = keep);
    wq/wk: (D, D) PyTorch (out, in) layout; bq/bk: (D,).
    Returns (context (B, S, D) f32, attn (B, S, S) attn_dtype)."""
    B, S, D = query.shape
    inv_sqrt_dim = 1.0 / math.sqrt(D)

    kind = _tpu_kind()
    is_v7x = "7" in kind
    is_v5 = "v5" in kind
    exp_dtype = jnp.float32 if is_v5 else jnp.bfloat16   # no bf16 EUP on v5e
    vmem_cap = _vmem_capacity_bytes(kind)
    vmem_limit = max(32 << 20, min(int(0.70 * vmem_cap), 100 << 20))
    attn_bytes = jnp.dtype(attn_dtype).itemsize

    # ---- plain-JAX glue ----------------------------------------------------
    # Pre-project K (same DMA bytes as raw keys; removes the cross-q-tile
    # scratch dependency so both grid axes can be "parallel").
    kp = key @ wk.T + bk                                       # (B, S, D) f32

    # Pad the feature dim to a lane-dense multiple of 128 (full MXU
    # contraction, unmasked vst on ctx).  Zero padding is exact; sliced off.
    Dp = ((D + 127) // 128) * 128
    pad = Dp - D
    if pad:
        query = jnp.pad(query, ((0, 0), (0, 0), (0, pad)))
        kp = jnp.pad(kp, ((0, 0), (0, 0), (0, pad)))
        value = jnp.pad(value, ((0, 0), (0, 0), (0, pad)))
        wq_t = jnp.zeros((Dp, Dp), jnp.float32).at[:D, :D].set(wq.T)
        bq_p = jnp.zeros((Dp,), jnp.float32).at[:D].set(bq)
    else:
        wq_t = wq.T
        bq_p = bq

    wq_b = (wq_t * inv_sqrt_dim).astype(jnp.bfloat16)   # fold 1/sqrt(D)
    bq2 = (bq_p * inv_sqrt_dim).reshape(1, Dp).astype(jnp.float32)
    q_b = query.astype(jnp.bfloat16)
    kp_b = kp.astype(jnp.bfloat16)
    v_b = value.astype(jnp.bfloat16)
    mask3 = mask.astype(jnp.int32).reshape(B, S, 1)

    if q_tile is not None:
        assert S % q_tile == 0, "q_tile must divide seq_len"
        TQ = q_tile
    else:
        TQ = _pick_q_tile(S, Dp, attn_bytes, int(0.45 * vmem_cap), is_v7x)
    n_q = S // TQ

    grid_spec = pltpu.PrefetchScalarGridSpec(
        num_scalar_prefetch=0,
        grid=(B, n_q),
        in_specs=[
            pl.BlockSpec((1, TQ, Dp), lambda b, q: (b, q, 0)),  # query tile
            pl.BlockSpec((1, S, Dp), lambda b, q: (b, 0, 0)),   # proj. keys (batch-resident)
            pl.BlockSpec((1, S, Dp), lambda b, q: (b, 0, 0)),   # values (batch-resident)
            pl.BlockSpec((1, TQ, 1), lambda b, q: (b, q, 0)),   # row-mask tile
            pl.BlockSpec((Dp, Dp), lambda b, q: (0, 0)),        # Wq^T * 1/sqrt(D)
            pl.BlockSpec((1, Dp), lambda b, q: (0, 0)),         # bq  * 1/sqrt(D)
        ],
        out_specs=[
            pl.BlockSpec((1, TQ, Dp), lambda b, q: (b, q, 0)),  # context
            pl.BlockSpec((1, TQ, S), lambda b, q: (b, q, 0)),   # attention
        ],
    )

    cost = pl.CostEstimate(
        flops=int(2 * B * S * Dp * (Dp + 2 * S)),        # Q-proj + QK^T + attn@V
        transcendentals=int(B * S * S),                   # exp
        bytes_accessed=int(3 * B * S * Dp * 2 + B * S * 4
                           + Dp * Dp * 2 + Dp * 4
                           + B * S * Dp * 4 + B * S * S * attn_bytes))

    context, attn = pl.pallas_call(
        functools.partial(_sdpa_kernel, exp_dtype=exp_dtype),
        out_shape=(
            jax.ShapeDtypeStruct((B, S, Dp), jnp.float32),
            jax.ShapeDtypeStruct((B, S, S), attn_dtype),
        ),
        grid_spec=grid_spec,
        compiler_params=pltpu.CompilerParams(
            dimension_semantics=("parallel", "parallel"),
            vmem_limit_bytes=vmem_limit),
        cost_estimate=cost,
    )(q_b, kp_b, v_b, mask3, wq_b, bq2)

    if pad:
        context = context[:, :, :D]
    return context, attn


# ----------------------------------------------------------------------------
# Pure-JAX reference + test
# ----------------------------------------------------------------------------
def _reference(query, key, value, mask, wq, bq, wk, bk):
    D = query.shape[-1]
    qp = query @ wq.T + bq
    kp = key @ wk.T + bk
    score = jnp.einsum("bsd,btd->bst", qp, kp) / math.sqrt(D)
    score = jnp.where(mask[:, :, None], score, NEG_INF)
    attn = jax.nn.softmax(score, axis=-1)
    ctx = jnp.einsum("bst,btd->bsd", attn, value)
    return ctx, attn


if __name__ == "__main__":
    def run_case(B, S, D, case, q_tile=None):
        key0 = jax.random.fold_in(jax.random.PRNGKey(0), case)
        kq, kk, kv, kwq, kbq, kwk, kbk, kmask = jax.random.split(key0, 8)

        query = jax.random.normal(kq, (B, S, D), dtype=jnp.float32)
        key_t = jax.random.normal(kk, (B, S, D), dtype=jnp.float32)
        value = jax.random.normal(kv, (B, S, D), dtype=jnp.float32)

        # deterministic "Linear" parameters (PyTorch layout: weight (out, in))
        bound = 1.0 / math.sqrt(D)
        wq = jax.random.uniform(kwq, (D, D), jnp.float32, -bound, bound)
        bq = jax.random.uniform(kbq, (D,), jnp.float32, -bound, bound)
        wk = jax.random.uniform(kwk, (D, D), jnp.float32, -bound, bound)
        bk = jax.random.uniform(kbk, (D,), jnp.float32, -bound, bound)

        # boolean mask over (batch, seq); mostly True, a few masked rows
        mask = jax.random.uniform(kmask, (B, S)) > 0.2

        ctx, attn = scaled_dot_product_attention(
            query, key_t, value, mask, wq, bq, wk, bk, q_tile=q_tile)
        jax.block_until_ready((ctx, attn))

        # f32 reference; kernel uses bf16 MXU operands, bf16 exp (v6e/v7x) and
        # a bf16 attn output, so the tolerance is loosened accordingly.
        ctx_ref, attn_ref = _reference(query, key_t, value, mask, wq, bq, wk, bk)
        np.testing.assert_allclose(np.asarray(attn.astype(jnp.float32)),
                                   np.asarray(attn_ref), rtol=3e-2, atol=3e-2)
        np.testing.assert_allclose(np.asarray(ctx), np.asarray(ctx_ref),
                                   rtol=3e-2, atol=3e-2)

    # Module-sized small shapes (seq=8, dim=32), exercises the D-padding path.
    run_case(2, 8, 32, case=0)
    # (8,128)-aligned shapes with q-tiling forced, exercises the tiled path.
    run_case(2, 256, 128, case=1, q_tile=128)
    print("KERNEL_OK")
</pallas_src>

<mosaic_0001>
module attributes {stable_mosaic.version = 11 : i64} {
  func.func @_sdpa_kernel(%arg0: i32, %arg1: i32, %arg2: memref<1x8x128xbf16, #tpu.memory_space<vmem>>, %arg3: memref<1x8x128xbf16, #tpu.memory_space<vmem>>, %arg4: memref<1x8x128xbf16, #tpu.memory_space<vmem>>, %arg5: memref<1x8x1xi32, #tpu.memory_space<vmem>>, %arg6: memref<128x128xbf16, #tpu.memory_space<vmem>>, %arg7: memref<1x128xf32, #tpu.memory_space<vmem>>, %arg8: memref<1x8x128xf32, #tpu.memory_space<vmem>>, %arg9: memref<1x8x8xbf16, #tpu.memory_space<vmem>>) attributes {dimension_semantics = [#tpu.dimension_semantics<parallel>, #tpu.dimension_semantics<parallel>], iteration_bounds = array<i64: 2, 1>, scalar_prefetch = 0 : i64, scratch_operands = 0 : i64, tpu.core_type = #tpu.core_type<tc>, window_params = [{transform_indices = @transform_0, window_bounds = array<i64: 1, 8, 128>}, {transform_indices = @transform_1, window_bounds = array<i64: 1, 8, 128>}, {transform_indices = @transform_2, window_bounds = array<i64: 1, 8, 128>}, {transform_indices = @transform_3, window_bounds = array<i64: 1, 8, 1>}, {pipeline_mode = #tpu.pipeline_mode<synchronous>, transform_indices = @transform_4, window_bounds = array<i64: 128, 128>}, {pipeline_mode = #tpu.pipeline_mode<synchronous>, transform_indices = @transform_5, window_bounds = array<i64: 1, 128>}, {transform_indices = @transform_6, window_bounds = array<i64: 1, 8, 128>}, {transform_indices = @transform_7, window_bounds = array<i64: 1, 8, 8>}]} {
    %c0 = arith.constant 0 : index
    %c0_0 = arith.constant 0 : index
    %c0_1 = arith.constant 0 : index
    %0 = vector.load %arg2[%c0, %c0_0, %c0_1] : memref<1x8x128xbf16, #tpu.memory_space<vmem>>, vector<1x8x128xbf16>
    %1 = vector.shape_cast %0 : vector<1x8x128xbf16> to vector<8x128xbf16>
    %c0_2 = arith.constant 0 : index
    %c0_3 = arith.constant 0 : index
    %2 = vector.load %arg6[%c0_2, %c0_3] : memref<128x128xbf16, #tpu.memory_space<vmem>>, vector<128x128xbf16>
    %cst = arith.constant dense<0.000000e+00> : vector<8x128xf32>
    %3 = tpu.matmul %1, %2, %cst {dimension_numbers = #tpu.dot_dimension_numbers<[1], [0], [0], [1], [0, 0, 1, 1], [], []>} : vector<8x128xbf16>, vector<128x128xbf16>, vector<8x128xf32> -> vector<8x128xf32>
    %c0_4 = arith.constant 0 : index
    %c0_5 = arith.constant 0 : index
    %4 = vector.load %arg7[%c0_4, %c0_5] : memref<1x128xf32, #tpu.memory_space<vmem>>, vector<1x128xf32>
    %5 = vector.broadcast %4 : vector<1x128xf32> to vector<8x128xf32>
    %6 = arith.addf %3, %5 : vector<8x128xf32>
    %7 = arith.truncf %6 : vector<8x128xf32> to vector<8x128xbf16>
    %c0_6 = arith.constant 0 : index
    %c0_7 = arith.constant 0 : index
    %c0_8 = arith.constant 0 : index
    %8 = vector.load %arg3[%c0_6, %c0_7, %c0_8] : memref<1x8x128xbf16, #tpu.memory_space<vmem>>, vector<1x8x128xbf16>
    %9 = vector.shape_cast %8 : vector<1x8x128xbf16> to vector<8x128xbf16>
    %cst_9 = arith.constant dense<0.000000e+00> : vector<8x8xf32>
    %10 = tpu.matmul %7, %9, %cst_9 {dimension_numbers = #tpu.dot_dimension_numbers<[1], [1], [0], [0], [0, 0, 1, 0], [], []>} : vector<8x128xbf16>, vector<8x128xbf16>, vector<8x8xf32> -> vector<8x8xf32>
    %c0_10 = arith.constant 0 : index
    %c0_11 = arith.constant 0 : index
    %c0_12 = arith.constant 0 : index
    %11 = vector.load %arg5[%c0_10, %c0_11, %c0_12] : memref<1x8x1xi32, #tpu.memory_space<vmem>>, vector<1x8x1xi32>
    %12 = vector.shape_cast %11 : vector<1x8x1xi32> to vector<8x1xi32>
    %c0_i32 = arith.constant 0 : i32
    %13 = vector.broadcast %c0_i32 : i32 to vector<8x1xi32>
    %14 = arith.cmpi ne, %12, %13 : vector<8x1xi32>
    %cst_13 = arith.constant -1.000000e+05 : f32
    %15 = vector.shape_cast %14 : vector<8x1xi1> to vector<8x1xi1>
    %16 = vector.broadcast %15 : vector<8x1xi1> to vector<8x8xi1>
    %17 = vector.broadcast %cst_13 : f32 to vector<8x8xf32>
    %18 = arith.select %16, %10, %17 : vector<8x8xi1>, vector<8x8xf32>
    %cst_14 = arith.constant dense<0xFF800000> : vector<8xf32>
    %19 = vector.multi_reduction <maximumf>, %18, %cst_14 [1] : vector<8x8xf32> to vector<8xf32>
    %20 = vector.shape_cast %19 : vector<8xf32> to vector<8x1xf32>
    %21 = vector.broadcast %20 : vector<8x1xf32> to vector<8x8xf32>
    %22 = arith.subf %18, %21 : vector<8x8xf32>
    %23 = arith.truncf %22 : vector<8x8xf32> to vector<8x8xbf16>
    %24 = math.exp %23 : vector<8x8xbf16>
    %25 = arith.extf %24 : vector<8x8xbf16> to vector<8x8xf32>
    %cst_15 = arith.constant dense<0.000000e+00> : vector<8xf32>
    %26 = vector.multi_reduction <add>, %25, %cst_15 [1] : vector<8x8xf32> to vector<8xf32>
    %27 = vector.shape_cast %26 : vector<8xf32> to vector<8x1xf32>
    %28 = tpu.reciprocal %27 : vector<8x1xf32> -> vector<8x1xf32>
    %29 = arith.truncf %28 : vector<8x1xf32> to vector<8x1xbf16>
    %30 = vector.broadcast %29 : vector<8x1xbf16> to vector<8x8xbf16>
    %31 = arith.mulf %24, %30 : vector<8x8xbf16>
    %c0_16 = arith.constant 0 : index
    %c0_17 = arith.constant 0 : index
    %c0_18 = arith.constant 0 : index
    %32 = vector.load %arg4[%c0_16, %c0_17, %c0_18] : memref<1x8x128xbf16, #tpu.memory_space<vmem>>, vector<1x8x128xbf16>
    %33 = vector.shape_cast %32 : vector<1x8x128xbf16> to vector<8x128xbf16>
    %cst_19 = arith.constant dense<0.000000e+00> : vector<8x128xf32>
    %34 = tpu.matmul %31, %33, %cst_19 {dimension_numbers = #tpu.dot_dimension_numbers<[1], [0], [0], [1], [0, 0, 1, 1], [], []>} : vector<8x8xbf16>, vector<8x128xbf16>, vector<8x128xf32> -> vector<8x128xf32>
    %c0_20 = arith.constant 0 : index
    %c0_21 = arith.constant 0 : index
    %c0_22 = arith.constant 0 : index
    %35 = vector.load %arg8[%c0_20, %c0_21, %c0_22] : memref<1x8x128xf32, #tpu.memory_space<vmem>>, vector<1x8x128xf32>
    %36 = vector.shape_cast %35 : vector<1x8x128xf32> to vector<8x128xf32>
    %37 = vector.shape_cast %34 : vector<8x128xf32> to vector<1x8x128xf32>
    tpu.vector_store %arg8[%c0_20, %c0_21, %c0_22], %37 {strides = array<i32>} : memref<1x8x128xf32, #tpu.memory_space<vmem>>, vector<1x8x128xf32>,
    %c0_23 = arith.constant 0 : index
    %c0_24 = arith.constant 0 : index
    %c0_25 = arith.constant 0 : index
    %38 = vector.load %arg9[%c0_23, %c0_24, %c0_25] : memref<1x8x8xbf16, #tpu.memory_space<vmem>>, vector<1x8x8xbf16>
    %39 = vector.shape_cast %38 : vector<1x8x8xbf16> to vector<8x8xbf16>
    %40 = vector.shape_cast %31 : vector<8x8xbf16> to vector<1x8x8xbf16>
    tpu.vector_store %arg9[%c0_23, %c0_24, %c0_25], %40 {strides = array<i32>} : memref<1x8x8xbf16, #tpu.memory_space<vmem>>, vector<1x8x8xbf16>,
    return
  }
  func.func @transform_0(%arg0: i32, %arg1: i32) -> (i32, i32, i32) {
    %c0_i32 = arith.constant 0 : i32
    %c0_i32_0 = arith.constant 0 : i32
    return %arg0, %arg1, %c0_i32 : i32, i32, i32
  }
  func.func @transform_1(%arg0: i32, %arg1: i32) -> (i32, i32, i32) {
    %c0_i32 = arith.constant 0 : i32
    %c0_i32_0 = arith.constant 0 : i32
    %c0_i32_1 = arith.constant 0 : i32
    return %arg0, %c0_i32, %c0_i32_0 : i32, i32, i32
  }
  func.func @transform_2(%arg0: i32, %arg1: i32) -> (i32, i32, i32) {
    %c0_i32 = arith.constant 0 : i32
    %c0_i32_0 = arith.constant 0 : i32
    %c0_i32_1 = arith.constant 0 : i32
    return %arg0, %c0_i32, %c0_i32_0 : i32, i32, i32
  }
  func.func @transform_3(%arg0: i32, %arg1: i32) -> (i32, i32, i32) {
    %c0_i32 = arith.constant 0 : i32
    %c0_i32_0 = arith.constant 0 : i32
    return %arg0, %arg1, %c0_i32 : i32, i32, i32
  }
  func.func @transform_4(%arg0: i32, %arg1: i32) -> (i32, i32) {
    %c0_i32 = arith.constant 0 : i32
    %c0_i32_0 = arith.constant 0 : i32
    %c0_i32_1 = arith.constant 0 : i32
    return %c0_i32, %c0_i32_0 : i32, i32
  }
  func.func @transform_5(%arg0: i32, %arg1: i32) -> (i32, i32) {
    %c0_i32 = arith.constant 0 : i32
    %c0_i32_0 = arith.constant 0 : i32
    %c0_i32_1 = arith.constant 0 : i32
    return %c0_i32, %c0_i32_0 : i32, i32
  }
  func.func @transform_6(%arg0: i32, %arg1: i32) -> (i32, i32, i32) {
    %c0_i32 = arith.constant 0 : i32
    %c0_i32_0 = arith.constant 0 : i32
    return %arg0, %arg1, %c0_i32 : i32, i32, i32
  }
  func.func @transform_7(%arg0: i32, %arg1: i32) -> (i32, i32, i32) {
    %c0_i32 = arith.constant 0 : i32
    %c0_i32_0 = arith.constant 0 : i32
    return %arg0, %arg1, %c0_i32 : i32, i32, i32
  }
}

</mosaic_0001>

<bundles_post_ra>
// kernel: tpu_custom_call.1
= control target key start
LH: loop header
LB: loop body
LE: loop exit
PB: predicated region body
PF: predicated region fallthrough
CT: control target
= control target key end

     0   :  { %s1877_s0 = inlined_call_operand.hbm [shape: bf16[2,8,128], index: 0, kind: input, shape index: {}]   ;;  %s1878_s1 = inlined_call_operand.hbm [shape: bf16[2,8,128], index: 1, kind: input, shape index: {}]   ;;  %s1879_s2 = inlined_call_operand.hbm [shape: bf16[2,8,128], index: 2, kind: input, shape index: {}]   ;;  %s1880_s3 = inlined_call_operand.hbm [shape: s32[2,8,1], index: 3, kind: input, shape index: {}]   ;;  %s1881_s4 = inlined_call_operand.hbm [shape: bf16[128,128], index: 4, kind: input, shape index: {}]   ;;  %s1882_s5 = inlined_call_operand.hbm [shape: f32[1,128], index: 5, kind: input, shape index: {}]   ;;  %s1883_s6 = inlined_call_operand.hbm [shape: f32[2,8,128], index: 6, kind: output, shape index: {0}]   ;;  %s1884_s7 = inlined_call_operand.hbm [shape: bf16[2,8,8], index: 7, kind: output, shape index: {1}]  }
   0x1   :  { %1902 = sst [smem:[#allocation28_spill]] %s1878_s1 }
   0x2   :  { %1903 = sst [smem:[#allocation29_spill]] %s1881_s4 }
   0x3   :  { %1904 = sst [smem:[#allocation30_spill]] %s1883_s6 }
   0x4   :  { %13 = vsyncpa [#allocation3], 0 }
   0x5   :  { %15 = vsyncpa [#allocation3 + $0x1], 0 }
   0x6   :  { %16 = vsyncpa [#allocation6], 0 }
   0x7   :  { %18 = vsyncpa [#allocation6 + $0x1], 0 }
   0x8   :  { %19 = vsyncpa [#allocation9], 0 }
   0x9   :  { %21 = vsyncpa [#allocation9 + $0x1], 0 }
   0xa   :  { %22 = vsyncpa [#allocation12], 0 }
   0xb   :  { %23 = vsyncpa [#allocation4], 0 }
   0xc   :  { %25 = vsyncpa [#allocation4 + $0x1], 0 }
   0xd   :  { %26 = vsyncpa [#allocation15], 0 }
   0xe   :  { %28 = vsyncpa [#allocation15 + $0x1], 0  ;;  %s1491_s24 = smov 0   ;;  %s1493_s25 = smov 0  }
   0xf   :  { %s1495_s26 = smov 0   ;;  %s1497_s27 = smov 0  }
  0x10   :  { %s1499_s28 = smov 0   ;;  %s1501_s29 = smov 0  }
  0x11 LB: > { %1905 = sst [smem:[#allocation23_spill]] %s1416_s24  ;;  %s1522_s30 = sadd.s32 4294967295, %s1436_s29   ;;  %s1436_s29 = sphi %s1501_s29, %s34_s29   ;;  %s1432_s28 = sphi %s1499_s28, %s1947_s28   ;;  %s1428_s27 = sphi %s1497_s27, %s1946_s27   ;;  %s1424_s26 = sphi %s1495_s26, %s1942_s26   ;;  %s1420_s25 = sphi %s1493_s25, %s1945_s25   ;;  %s1416_s24 = sphi %s1491_s24, %s1944_s24  }
  0x12   : > { %1906 = sst [smem:[#allocation24_spill]] %s1424_s26  ;;  %s926_s8 = sadd.s32 4294967294, %s1436_s29  }
  0x13   : > { %p68_p0 = scmp.ne.s32.totalorder %s1420_s25, %s1416_s24  ;;  %p1885_p1 = scmp.eq.s32.totalorder %s1522_s30, 0 }
  0x14   : > { %p222_p3 = scmp.eq.s32.totalorder %s926_s8, 1  ;;  %p927_p5 = scmp.ge.s32.totalorder %s1436_s29, 1 }
  0x15   : > { %p1531_p4 = por %p1885_p1, %p68_p0  ;;  %p257_p7 = scmp.lt.s32.totalorder %s1436_s29, 3 }
  0x16   : > { %p1536_p6 = por %p222_p3, %p68_p0  ;;  %s1438_s12 = smov [#allocation10]  }
  0x17   : > { %s1907_s9 = scalar_select %p1531_p4, 1, 0 }
  0x18   : > { %s1908_s10 = scalar_select %p1536_p6, 1, 0 }
  0x19   : > { %p1541_p8 = pnand %p927_p5, %p257_p7  ;;  %s269_s13 = sshll.u32 %s1438_s12, 4  ;;  %s270_s13 = int_to_ptr.vmem [resolvable:$true] %s269_s13 }
  0x1a   : > { %1909 = sst [smem:[#allocation25_spill]] %s1908_s10  ;;  %s46_s15 = sadd.s32 1, %s1432_s28 }
  0x1b   : > { %s1910_s11 = scalar_select %p1541_p8, 1, 0 }
  0x1c   : > { %p1029_p9 = pneg %p1541_p8  ;;  %s1912_s4 = sld [smem:[#allocation29_spill]] }
  0x1e   : > { %p1550_p11 = pnand %p1029_p9, %p1885_p1 }
  0x20   : > { %s1911_s14 = scalar_select %p1550_p11, 1, 0 }
  0x21   : > { %p1893_p13 = pneg %p1550_p11 }
  0x22   : > { %s1130_s18 = scalar_lea.hbm %s1912_s4, 1024 }
  0x23   : > { %p1131_p12 = scmp.ne.s32.totalorder %s1912_s4, %s1130_s18  ;;  %p1137_p5 = scmp.lt.u32.totalorder %s1130_s18, %s1912_s4 }
  0x25   : > { %p1133_p0 = pnand %p1893_p13, %p1131_p12 }
  0x27   : > { %p1134_p3 = pneg %p1133_p0 }
  0x29   : > { %p1139_p7 = pnand %p1137_p5, %p1134_p3 }
  0x2b   : > { %1142 = shalt.err (!%p1139_p7)
}
  0x2c   : > { %s1143_s23 = scalar_lea.vmem %s270_s13, 1024  ;;  %p1151_p2 = scmp.lt.s32.totalorder %s270_s13, %s270_s13 }
  0x2d   : > { %p1144_p9 = scmp.ne.s32.totalorder %s270_s13, %s1143_s23  ;;  %p1152_p6 = scmp.lt.s32.totalorder %s1143_s23, %s1143_s23 }
  0x2f   : > { %p1146_p10 = pnand %p1144_p9, %p1893_p13  ;;  %p1153_p4 = por %p1152_p6, %p1151_p2 }
  0x31   : > { %p1147_p1 = pneg %p1146_p10 }
  0x33   : > { %p1154_p8 = pnand %p1153_p4, %p1147_p1 }
  0x35   : > { %1157 = shalt.err (!%p1154_p8)
}
  0x36   : > { %s1439_s8 = smov 64   ;;  %s1440_s12 = smov 4  }
  0x37   : > { %1032 = dma.hbm_to_vmem [thread:$0]  (!%p1550_p11), %s1912_s4, 1024, %s270_s13, [#allocation9], %s1439_s8, %s1439_s8, %s1440_s12  }
  0x38   : > { %p48_p1 = scmp.ge.s32.totalorder %s46_s15, 2  ;;  %s55_s18 = sadd.s32 1, %s1424_s26 }
  0x39   : > { %p62_p2 = scmp.ne.s32.totalorder %s1424_s26, %s1420_s25  ;;  %p63_p4 = scmp.eq.s32.totalorder %s1436_s29, 0 }
  0x3a   : > { %s1949_s15 = smov (%p48_p1, %s46_s15), 0  ;;  %p1914_p8 = scmp.eq.s32.totalorder %s1522_s30, 1 }
  0x3b   : > { %1913 = sst [smem:[#allocation26_spill]] %s1949_s15  ;;  %p64_p6 = por %p63_p4, %p62_p2 }
  0x3c   : > { %p1585_p10 = por %p1914_p8, %p62_p2  ;;  %s50_s20 = ssub.s32 %s1432_s28, %s1949_s15 }
  0x3d   : > { %p1058_p12 = scmp.lt.s32.totalorder %s1436_s29, 2  ;;  %p53_p0 = scmp.eq.s32.totalorder %s50_s20, 0 }
  0x3e   : > { %s1915_s19 = scalar_select %p1585_p10, 1, 0 }
  0x3f   : > { %s1593_s21 = sand.u32 1, %s1424_s26   ;;  %s1599_s22 = sshll.u32 %s1432_s28, 6 }
  0x40   : > { %s1596_s13 = sshll.u32 %s1593_s21, 2  ;;  %p1604_p3 = pnand %p1058_p12, %p64_p6 }
  0x41   : > { %s1602_s23 = scalar_select %p53_p0, %s1424_s26, %s55_s18  }
  0x42   : > { %s1917_s8 = scalar_select %p1604_p3, 1, 0 }
  0x43   : > { %1916 = sst [smem:[#allocation27_spill]] %s1602_s23  ;;  %s1892_s12 = sand.u32 1, %s1436_s29  }
  0x44   : > { %s1918_s1 = sld [smem:[#allocation28_spill]]  ;;  %s317_s4 = scalar_lea.vmem [#allocation5], %s1596_s13 }
  0x45   : > { %s324_s15 = sshll.u32 %s317_s4, 4  ;;  %s1620_s18 = scalar_lea.sflag [#allocation6], %s1892_s12  ;;  %s1616_s15 = int_to_ptr.vmem [resolvable:$true] %s324_s15 }
  0x46   : > { %p1626_p7 = pneg %p1604_p3 }
  0x48   : > { %s1919_s26 = scalar_select %p1626_p7, 1, 0 }
  0x4a   : > { %s1613_s20 = scalar_lea.hbm %s1918_s1, %s1599_s22  ;;  %s1163_s4 = scalar_lea.hbm %s1918_s1, 128 }
  0x4b   : > { %s1158_s23 = scalar_lea.hbm %s1613_s20, 64  ;;  %p1164_p2 = scmp.lt.u32.totalorder %s1613_s20, %s1918_s1 }
  0x4c   : > { %p1159_p5 = scmp.ne.s32.totalorder %s1613_s20, %s1158_s23  ;;  %p1165_p4 = scmp.lt.u32.totalorder %s1163_s4, %s1158_s23 }
  0x4d   : > { %p1167_p8 = scmp.lt.u32.totalorder %s1158_s23, %s1613_s20 }
  0x4e   : > { %p1161_p9 = pnand %p1626_p7, %p1159_p5  ;;  %p1166_p6 = por %p1165_p4, %p1164_p2 }
  0x50   : > { %p1162_p1 = pneg %p1161_p9  ;;  %p1168_p12 = por %p1167_p8, %p1166_p6 }
  0x52   : > { %p1169_p0 = pnand %p1168_p12, %p1162_p1 }
  0x54   : > { %1172 = shalt.err (!%p1169_p0)
}
  0x55   : > { %s1173_s12 = scalar_lea.vmem %s1616_s15, 64  ;;  %s1441_s16 = smov [#allocation5]  }
  0x56   : > { %p1174_p5 = scmp.ne.s32.totalorder %s1616_s15, %s1173_s12  ;;  %s1178_s17 = sshll.u32 %s1441_s16, 4  ;;  %s1179_s17 = int_to_ptr.vmem [resolvable:$false] %s1178_s17 }
  0x57   : > { %s1180_s24 = scalar_lea.vmem %s1179_s17, 128  ;;  %p1181_p10 = scmp.lt.s32.totalorder %s1616_s15, %s1179_s17 }
  0x58   : > { %p1176_p9 = pnand %p1174_p5, %p1626_p7  ;;  %p1182_p11 = scmp.lt.s32.totalorder %s1180_s24, %s1173_s12 }
  0x5a   : > { %p1177_p13 = pneg %p1176_p9  ;;  %p1183_p2 = por %p1182_p11, %p1181_p10 }
  0x5c   : > { %p1184_p4 = pnand %p1183_p2, %p1177_p13 }
  0x5e   : > { %1187 = shalt.err (!%p1184_p4)
}
  0x5f   : > { %1042 = dma.hbm_to_vmem [thread:$0]  (!%p1604_p3), %s1613_s20, 64, %s1616_s15, %s1620_s18  }
  0x60   : > { %s1442_s10 = smov [#allocation11]   ;;  %s1188_s16 = scalar_lea.hbm %s1882_s5, 16 }
  0x61   : > { %s283_s23 = sshll.u32 %s1442_s10, 4  ;;  %p1189_p11 = scmp.ne.s32.totalorder %s1882_s5, %s1188_s16  ;;  %s284_s23 = int_to_ptr.vmem [resolvable:$true] %s283_s23 }
  0x62   : > { %p1920_p13 = scmp.ne.s32.totalorder %s1911_s14, 0  ;;  %p1195_p8 = scmp.lt.u32.totalorder %s1188_s16, %s1882_s5 }
  0x64   : > { %p1921_p10 = pneg %p1920_p13 }
  0x66   : > { %p1191_p1 = pnand %p1189_p11, %p1921_p10 }
  0x68   : > { %p1192_p6 = pneg %p1191_p1 }
  0x6a   : > { %p1197_p12 = pnand %p1195_p8, %p1192_p6 }
  0x6c   : > { %1200 = shalt.err (!%p1197_p12)
}
  0x6d   : > { %s1201_s15 = scalar_lea.vmem %s284_s23, 16  ;;  %p1922_p5 = pmov %p1921_p10 }
  0x6e   : > { %p1202_p0 = scmp.ne.s32.totalorder %s284_s23, %s1201_s15  ;;  %s1208_s1 = scalar_lea.vmem %s284_s23, 32 }
  0x6f   : > { %p1209_p4 = scmp.lt.s32.totalorder %s284_s23, %s284_s23  ;;  %p1210_p3 = scmp.lt.s32.totalorder %s1208_s1, %s1201_s15 }
  0x70   : > { %p1204_p9 = pnand %p1202_p0, %p1922_p5 }
  0x71   : > { %p1211_p7 = por %p1210_p3, %p1209_p4 }
  0x72   : > { %p1205_p2 = pneg %p1204_p9 }
  0x74   : > { %p1212_p10 = pnand %p1211_p7, %p1205_p2 }
  0x76   : > { %1215 = shalt.err (!%p1212_p10)
}
  0x77   : > { %1035 = dma.hbm_to_vmem [thread:$0]  (!%p1920_p13), %s1882_s5, 16, %s284_s23, [#allocation12]  }
  0x78   : > { %s1674_s16 = scalar_lea.hbm %s1877_s0, %s1599_s22  ;;  %s298_s17 = scalar_lea.vmem [#allocation2], %s1596_s13 }
  0x79   : > { %s306_s12 = sshll.u32 %s298_s17, 4  ;;  %s295_s14 = scalar_lea.sflag [#allocation3], %s1593_s21  ;;  %s307_s12 = int_to_ptr.vmem [resolvable:$true] %s306_s12 }
  0x7a   : > { %s1216_s24 = scalar_lea.hbm %s1674_s16, 64  ;;  %p1923_p7 = scmp.ne.s32.totalorder %s1919_s26, 0 }
  0x7b   : > { %p1217_p3 = scmp.ne.s32.totalorder %s1674_s16, %s1216_s24  ;;  %s1221_s1 = scalar_lea.hbm %s1877_s0, 128 }
  0x7c   : > { %p1222_p13 = scmp.lt.u32.totalorder %s1674_s16, %s1877_s0  ;;  %p1223_p6 = scmp.lt.u32.totalorder %s1221_s1, %s1216_s24 }
  0x7d   : > { %p1219_p11 = pnand %p1217_p3, %p1923_p7  ;;  %p1225_p12 = scmp.lt.u32.totalorder %s1216_s24, %s1674_s16 }
  0x7e   : > { %p1224_p8 = por %p1223_p6, %p1222_p13 }
  0x7f   : > { %p1220_p1 = pneg %p1219_p11 }
  0x80   : > { %p1226_p0 = por %p1225_p12, %p1224_p8 }
  0x82   : > { %p1227_p5 = pnand %p1226_p0, %p1220_p1 }
  0x84   : > { %1230 = shalt.err (!%p1227_p5)
}
  0x85   : > { %s1231_s10 = scalar_lea.vmem %s307_s12, 64  ;;  %s1443_s4 = smov [#allocation2]  }
  0x86   : > { %p1232_p9 = scmp.ne.s32.totalorder %s307_s12, %s1231_s10  ;;  %s1236_s17 = sshll.u32 %s1443_s4, 4  ;;  %s1237_s17 = int_to_ptr.vmem [resolvable:$false] %s1236_s17 }
  0x87   : > { %s1238_s15 = scalar_lea.vmem %s1237_s17, 128  ;;  %p1239_p10 = scmp.lt.s32.totalorder %s307_s12, %s1237_s17 }
  0x88   : > { %p1234_p2 = pnand %p1232_p9, %p1923_p7  ;;  %p1240_p3 = scmp.lt.s32.totalorder %s1238_s15, %s1231_s10 }
  0x8a   : > { %p1235_p4 = pneg %p1234_p2  ;;  %p1241_p11 = por %p1240_p3, %p1239_p10 }
  0x8c   : > { %p1242_p6 = pnand %p1241_p11, %p1235_p4 }
  0x8e   : > { %1245 = shalt.err (!%p1242_p6)
}
  0x8f   : > { %p1924_p13 = scmp.ne.s32.totalorder %s1917_s8, 0  ;;  %s1699_s1 = scalar_lea.hbm %s1879_s2, %s1599_s22 }
  0x90   : > { %s335_s6 = scalar_lea.vmem [#allocation7], %s1596_s13  ;;  %s937_s10 = sshll.u32 %s1593_s21, 3 }
  0x91   : > { %1039 = dma.hbm_to_vmem [thread:$0]  (!%p1924_p13), %s1674_s16, 64, %s307_s12, %s295_s14  }
  0x92   : > { %s342_s20 = sshll.u32 %s335_s6, 4  ;;  %s1246_s4 = scalar_lea.hbm %s1699_s1, 64  ;;  %s343_s20 = int_to_ptr.vmem [resolvable:$true] %s342_s20 }
  0x93   : > { %p1247_p1 = scmp.ne.s32.totalorder %s1699_s1, %s1246_s4  ;;  %s1251_s12 = scalar_lea.hbm %s1879_s2, 128 }
  0x94   : > { %p1252_p0 = scmp.lt.u32.totalorder %s1699_s1, %s1879_s2  ;;  %p1253_p5 = scmp.lt.u32.totalorder %s1251_s12, %s1246_s4 }
  0x95   : > { %p1249_p8 = pnand %p1247_p1, %p1923_p7  ;;  %p1255_p2 = scmp.lt.u32.totalorder %s1246_s4, %s1699_s1 }
  0x96   : > { %p1254_p9 = por %p1253_p5, %p1252_p0 }
  0x97   : > { %p1250_p12 = pneg %p1249_p8 }
  0x98   : > { %p1256_p4 = por %p1255_p2, %p1254_p9 }
  0x9a   : > { %p1257_p10 = pnand %p1256_p4, %p1250_p12 }
  0x9c   : > { %1260 = shalt.err (!%p1257_p10)
}
  0x9d   : > { %s1261_s13 = scalar_lea.vmem %s343_s20, 64  ;;  %s1444_s15 = smov [#allocation7]  }
  0x9e   : > { %p1262_p3 = scmp.ne.s32.totalorder %s343_s20, %s1261_s13  ;;  %s1266_s24 = sshll.u32 %s1444_s15, 4  ;;  %s1267_s24 = int_to_ptr.vmem [resolvable:$false] %s1266_s24 }
  0x9f   : > { %s1268_s23 = scalar_lea.vmem %s1267_s24, 128  ;;  %p1269_p1 = scmp.lt.s32.totalorder %s343_s20, %s1267_s24 }
  0xa0   : > { %p1264_p11 = pnand %p1262_p3, %p1923_p7  ;;  %p1270_p8 = scmp.lt.s32.totalorder %s1268_s23, %s1261_s13 }
  0xa2   : > { %p1265_p6 = pneg %p1264_p11  ;;  %p1271_p13 = por %p1270_p8, %p1269_p1 }
  0xa4   : > { %p1272_p0 = pnand %p1271_p13, %p1265_p6 }
  0xa6   : > { %1275 = shalt.err (!%p1272_p0)
}
  0xa7   : > { %p1925_p5 = scmp.ne.s32.totalorder %s1917_s8, 0  ;;  %s938_s6 = sshll.u32 %s1432_s28, 7 }
  0xa8   : > { %s1725_s16 = scalar_lea.hbm %s1880_s3, %s938_s6  ;;  %s353_s12 = scalar_lea.vmem [#allocation8], %s937_s10 }
  0xa9   : > { %1045 = dma.hbm_to_vmem [thread:$0]  (!%p1925_p5), %s1699_s1, 64, %s343_s20, %s1620_s18  }
  0xaa   : > { %s361_s14 = sshll.u32 %s353_s12, 4  ;;  %s1926_s22 = sand.u32 1, %s1436_s29   ;;  %s362_s14 = int_to_ptr.vmem [resolvable:$true] %s361_s14 }
  0xab   : > { %s350_s13 = scalar_lea.sflag [#allocation9], %s1926_s22  ;;  %s1276_s15 = scalar_lea.hbm %s1725_s16, 128 }
  0xac   : > { %p1277_p13 = scmp.ne.s32.totalorder %s1725_s16, %s1276_s15  ;;  %s1281_s20 = scalar_lea.hbm %s1880_s3, 256 }
  0xad   : > { %p1282_p2 = scmp.lt.u32.totalorder %s1725_s16, %s1880_s3  ;;  %p1283_p4 = scmp.lt.u32.totalorder %s1281_s20, %s1276_s15 }
  0xae   : > { %p1279_p12 = pnand %p1277_p13, %p1923_p7  ;;  %p1285_p3 = scmp.lt.u32.totalorder %s1276_s15, %s1725_s16 }
  0xaf   : > { %p1284_p10 = por %p1283_p4, %p1282_p2 }
  0xb0   : > { %p1280_p9 = pneg %p1279_p12 }
  0xb1   : > { %p1286_p11 = por %p1285_p3, %p1284_p10 }
  0xb3   : > { %p1287_p6 = pnand %p1286_p11, %p1280_p9 }
  0xb5   : > { %1290 = shalt.err (!%p1287_p6)
}
  0xb6   : > { %s1291_s10 = scalar_lea.vmem %s362_s14, 128  ;;  %s1445_s23 = smov [#allocation8]  }
  0xb7   : > { %p1292_p1 = scmp.ne.s32.totalorder %s362_s14, %s1291_s10  ;;  %s1296_s6 = sshll.u32 %s1445_s23, 4  ;;  %s1297_s6 = int_to_ptr.vmem [resolvable:$false] %s1296_s6 }
  0xb8   : > { %s1298_s4 = scalar_lea.vmem %s1297_s6, 256  ;;  %p1299_p13 = scmp.lt.s32.totalorder %s362_s14, %s1297_s6 }
  0xb9   : > { %p1294_p8 = pnand %p1292_p1, %p1923_p7  ;;  %p1300_p12 = scmp.lt.s32.totalorder %s1298_s4, %s1291_s10 }
  0xbb   : > { %p1295_p0 = pneg %p1294_p8  ;;  %p1301_p5 = por %p1300_p12, %p1299_p13 }
  0xbd   : > { %p1302_p2 = pnand %p1301_p5, %p1295_p0 }
  0xbf   : > { %1305 = shalt.err (!%p1302_p2)
}
  0xc0   : > { %p1927_p4 = scmp.ne.s32.totalorder %s1917_s8, 0  ;;  %p1928_p9 = scmp.ne.s32.totalorder %s1910_s11, 0 }
  0xc1   : > { %s1751_s26 = sand.u32 (!%p1928_p9), 1, %s1420_s25   ;;  %p1929_p7 = scmp.ne.s32.totalorder (!%p1928_p9), %s1907_s9, 0 }
  0xc2   : > { %1048 = dma.hbm_to_vmem [thread:$0]  (!%p1927_p4), %s1725_s16, 128, %s362_s14, %s350_s13  }
  0xc3   : > { %370 = sbr.rel (%p1928_p9) target bundleno = 1226 (0x4ca), region = 44  ;;  %s1754_s17 = sshll.u32 (!%p1928_p9), %s1751_s26, 2 }
  0xc4   : > { %s373_s12 = scalar_lea.sflag (!%p1928_p9), [#allocation3], %s1751_s26  ;;  %s376_s22 = scalar_lea.vmem (!%p1928_p9), [#allocation2], %s1754_s17 }
  0xca   : > { %1387 = dma.done.wait (%p1929_p7), %s373_s12, 64  }
  0xcb   : > { %1389 = vsyncadd (%p1929_p7), %s373_s12, 4294967232  ;;  %s381_s11 = sand.u32 1, %s1522_s30   ;;  %s385_s16 = scalar_lea.vmem [#allocation5], %s1754_s17 }
  0xcc   : > { %s382_s8 = scalar_lea.sflag [#allocation6], %s381_s11 }
  0xcd   : > { %1391 = dma.done.wait (%p1929_p7), %s382_s8, 128  }
  0xce   : > { %1393 = vsyncadd (%p1929_p7), %s382_s8, 4294967168  ;;  %s943_s14 = sshll.u32 %s1751_s26, 3  ;;  %s394_s13 = scalar_lea.vmem [#allocation7], %s1754_s17 }
  0xcf   : > { %s400_s15 = scalar_lea.sflag [#allocation9], %s381_s11  ;;  %s1772_s18 = scalar_lea.vmem [#allocation8], %s943_s14 }
  0xd0   : > { %1395 = dma.done.wait (%p1929_p7), %s400_s15, 128  }
  0xd1   : > { %1397 = vsyncadd (%p1929_p7), %s400_s15, 4294967168  ;;  %p1930_p5 = scmp.eq.s32.totalorder %s1522_s30, 0 }
  0xd3   : > { %1399 = dma.done.wait (%p1930_p5), [#allocation9], 1024   ;;  %p1931_p10 = pmov %p1930_p5 }
  0xd4   : > { %p1932_p3 = pmov %p1930_p5 }
  0xd5   : > { %1401 = vsyncadd (%p1931_p10), [#allocation9], 4294966272 }
  0xd6   : > { %1403 = dma.done.wait (%p1932_p3), [#allocation12], 16   ;;  %p1933_p11 = pmov %p1932_p3 }
  0xd7   : > { %v1446_v0 = vmov 0.0   ;;  %vm1447_vm0 = vmmov 0   ;;  %v1118_v1 = vld [vmem:[#allocation10] sm:$0xff]   ;;  %v1119_v2 = vld [vmem:[#allocation10 + $0x8] sm:$0xff]   ;;  %v1120_v3 = vld [vmem:[#allocation10 + $0x10] sm:$0xff]   ;;  %v1448_v12 = vmov 0  }
  0xd8   : > { %1405 = vsyncadd (%p1933_p11), [#allocation12], 4294967280  ;;  %977 = vmatprep.subr.bf16.mxu0 %v1446_v0  ;;  %993 = vmatprep.mubr.msk.bf16.mxu0 %vm1447_vm0, %v1446_v0  ;;  %v576_v4 = vld [vmem:[%s385_s16] sm:$0xf]  ;;  %v1121_v5 = vld [vmem:[#allocation10 + $0x18] sm:$0xff]   ;;  %vm625_vm3 = vcmask 64512  }
  0xd9   : > { %997 = vmatprep.subr.bf16.mxu1 %v1446_v0  ;;  %999 = vmatprep.mubr.msk.bf16.mxu1 %vm1447_vm0, %v1446_v0  ;;  %v1122_v6 = vld [vmem:[#allocation10 + $0x20] sm:$0xff]   ;;  %v1123_v7 = vld [vmem:[#allocation10 + $0x28] sm:$0xff]   ;;  %v1124_v8 = vld [vmem:[#allocation10 + $0x30] sm:$0xff]   ;;  %vm645_vm4 = vcmask 1043456   ;;  %vm690_vm5 = vcmask 60416   ;;  %s461_s30 = scalar_lea.vmem [#allocation14], %s1754_s17 }
  0xda   : > { %978 = vmatpush3.bf16.msra.mxu0 %v1118_v1  ;;  %998 = vmatpush3.bf16.xpose.msra.mxu1 %v576_v4  ;;  %v1125_v9 = vld [vmem:[#allocation10 + $0x38] sm:$0xff]   ;;  %v948_v14 = vld [vmem:[#allocation11] ss:$0 sm:$0xff]  ;;  %v641_v35 = vld [vmem:[%s394_s13] sm:$0xf]  ;;  %s961_s9 = sshll.u32 %s1428_s27, 6 }
  0xdb   : > { %979 = vmatprep.subr.bf16.mxu0 %v1446_v0  ;;  %1003 = vmatprep.subr.bf16.mxu1 %v1446_v0  ;;  %v463_v10 = vld [vmem:[%s376_s22] sm:$0xf]  ;;  %v647_v36 = vsel %vm645_vm4, %v641_v35, 0  ;;  %s726_s1 = sshll.u32 %s461_s30, 4  ;;  %s1802_s21 = scalar_lea.hbm %s1884_s7, %s961_s9  ;;  %s727_s1 = int_to_ptr.vmem [resolvable:$true] %s726_s1 }
  0xdc   : > { %v617_v11 = vld [vmem:[%s1772_s18] sm:$0xff]  ;;  %1117 = vset.pattern.permute.xlu0 %v1448_v12  ;;  %s698_s10 = scalar_lea.sflag [#allocation15], %s1751_s26  ;;  %s1306_s23 = scalar_lea.vmem %s727_s1, 64 }
  0xdd   : > { %vm618_vm1 = vcmp.ne.s32.totalorder %v617_v11, 0  ;;  %p1307_p6 = scmp.ne.s32.totalorder %s727_s1, %s1306_s23  ;;  %p1934_p1 = scmp.ne.s32.totalorder %s1915_s19, 0 }
  0xde   : > { %980 = vmatpush3.bf16.msra.mxu0 %v1119_v2  ;;  %v619_v13 = vsel %vm618_vm1, 1, %v1448_v12  ;;  %s1449_s6 = smov [#allocation14]  }
  0xdf   : > { %981 = vmatprep.subr.bf16.mxu0 %v1446_v0  ;;  %621 = vperm.xlu0 %1117, %v619_v13   ;;  %p1308_p8 = pnand %p1307_p6, %p1934_p1  ;;  %s1310_s4 = sshll.u32 %s1449_s6, 4  ;;  %s1311_s4 = int_to_ptr.vmem [resolvable:$false] %s1310_s4 }
  0xe0   : > { %s1312_s12 = scalar_lea.vmem %s1311_s4, 128  ;;  %p1313_p13 = scmp.lt.s32.totalorder %s727_s1, %s1311_s4 }
  0xe1   : > { %p1309_p0 = pneg %p1308_p8  ;;  %p1314_p12 = scmp.lt.s32.totalorder %s1312_s12, %s1306_s23 }
  0xe2   : > { %982 = vmatpush3.bf16.msra.mxu0 %v1120_v3 }
  0xe3   : > { %983 = vmatprep.subr.bf16.mxu0 %v1446_v0  ;;  %p1315_p2 = por %p1314_p12, %p1313_p13 }
  0xe5   : > { %p1316_p4 = pnand %p1315_p2, %p1309_p0 }
  0xe6   : > { %984 = vmatpush3.bf16.msra.mxu0 %v1121_v5 }
  0xe7   : > { %985 = vmatprep.subr.bf16.mxu0 %v1446_v0 }
  0xea   : > { %986 = vmatpush3.bf16.msra.mxu0 %v1122_v6 }
  0xeb   : > { %987 = vmatprep.subr.bf16.mxu0 %v1446_v0 }
  0xee   : > { %988 = vmatpush3.bf16.msra.mxu0 %v1123_v7 }
  0xef   : > { %989 = vmatprep.subr.bf16.mxu0 %v1446_v0 }
  0xf2   : > { %990 = vmatpush3.bf16.msra.mxu0 %v1124_v8 }
  0xf3   : > { %991 = vmatprep.subr.bf16.mxu0 %v1446_v0 }
  0xf6   : > { %992 = vmatpush3.bf16.msra.mxu0 %v1125_v9 }
  0xf9   : > { %994 = vmatmul.mubr.bf16.vlgmr.msra.gmra.mrb[0].mxu0 %v463_v10 }
 0x15e   : > { %v622_v21 = vpop.permute.xlu0 %621 }
 0x15f   : > { %vm623_vm2 = vcmp.eq.s32.totalorder %v622_v21, 1 }
 0x1cc   : > { %v569_v15 = vpop.f32.mrb[0].mxu0 }
 0x1cd   : > { %v570_v16 = vadd.f32 %v948_v14, %v569_v15  ;;  %v995_v17 = vpop.f32.mrb[1].mxu0 }
 0x1ce   : > { %v572_v18 = vpop.f32.mrb[2].mxu0 }
 0x1cf   : > { %v575_v19 = vpack.c.bf16 %v570_v16, %v570_v16  ;;  %v996_v20 = vpop.f32.mrb[3].mxu0 }
 0x1d1   : > { %1000 = vmatmul.mubr.bf16.vlgmr.msra.gmra.mrb[0].mxu1 %v575_v19 }
 0x1d2   : > { %1005 = vmatprep.mubr.msk.bf16.mxu1 %vm1447_vm0, %v1446_v0  ;;  %1004 = vmatpush3.bf16.msra.mxu1 %v647_v36 }
 0x2a4   : > { %v611_v22 = vpop.f32.mrb[0].mxu1 }
 0x2a5   : > { %v624_v23 = vsel %vm623_vm2, %v611_v22, -100000.0  ;;  %v1001_v24 = vpop.f32.mrb[1].mxu1 }
 0x2a6   : > { %v614_v25 = vpop.f32.mrb[2].mxu1  ;;  %v626_v26 = vsel %vm625_vm3, %v624_v23, -inf }
 0x2a7   : > { %627 = vmax.xlane.f32.xlu0 %v626_v26  ;;  %v1002_v27 = vpop.f32.mrb[3].mxu1 }
 0x334   : > { %v628_v28 = vpop.xlane.xlu0 %627 }
 0x335   : > { %v629_v29 = vsub.f32 %v624_v23, %v628_v28 }
 0x337   : > { %v630_v30 = vpack.c.bf16 %v629_v29, %v629_v29 }
 0x339   : > { %v632_v31 = vmul.bf16 1069105081, %v630_v30 }
 0x33b   : > { %1126 = vpow.bf16 %v632_v31 }
 0x346   : > { %v1127_v32 = vpop.eup %1126 }
 0x347   : > { %v634_v33 = vunpack.c.l.bf16 %v1127_v32 }
 0x349   : > { %v635_v34 = vsel %vm625_vm3, %v634_v33, 0.0 }
 0x34a   : > { %636 = vadd.xlane.f32.xlu1 %v635_v34 }
 0x3d7   : > { %v637_v37 = vpop.xlane.xlu1 %636 }
 0x3d8   : > { %1128 = vrcp.f32 %v637_v37 }
 0x3e2   : > { %v1129_v38 = vpop.eup %1128 }
 0x3e3   : > { %v639_v39 = vpack.c.bf16 %v1129_v38, %v1129_v38 }
 0x3e5   : > { %v640_v40 = vmul.bf16 %v1127_v32, %v639_v39 }
 0x3e7   : > { %1006 = vmatmul.mubr.msk.bf16.vlgmr.msra.gmra.mrb[4].mxu1 %vm625_vm3, %v640_v40  ;;  %691 = vst.msk [vmem:[%s461_s30] sm:$0xf] %vm690_vm5, %v640_v40 }
 0x3e8   : > { %1319 = shalt.err (!%p1316_p4)
}
 0x3e9   : > { %s1320_s17 = scalar_lea.hbm %s1802_s21, 64  ;;  %s1324_s8 = scalar_lea.hbm %s1884_s7, 128 }
 0x3ea   : > { %p1321_p9 = scmp.ne.s32.totalorder %s1802_s21, %s1320_s17  ;;  %p1325_p10 = scmp.lt.u32.totalorder %s1802_s21, %s1884_s7 }
 0x3eb   : > { %p1326_p3 = scmp.lt.u32.totalorder %s1324_s8, %s1320_s17  ;;  %p1328_p6 = scmp.lt.u32.totalorder %s1320_s17, %s1802_s21 }
 0x3ec   : > { %p1322_p7 = pnand %p1321_p9, %p1934_p1 }
 0x3ed   : > { %p1327_p11 = por %p1326_p3, %p1325_p10 }
 0x3ee   : > { %p1323_p5 = pneg %p1322_p7 }
 0x3ef   : > { %p1329_p8 = por %p1328_p6, %p1327_p11 }
 0x3f1   : > { %p1330_p0 = pnand %p1329_p8, %p1323_p5 }
 0x3f3   : > { %1333 = shalt.err (!%p1330_p0)
}
 0x3f4   : > { %1026 = dma.vmem_to_hbm [thread:$0]  (%p1934_p1), %s727_s1, 64, %s1802_s21, %s698_s10  }
 0x3f5   : > { %s454_s15 = scalar_lea.vmem [#allocation13], %s943_s14  ;;  %s960_s30 = sshll.u32 %s1428_s27, 7 }
 0x3f6   : > { %s712_s18 = sshll.u32 %s454_s15, 4  ;;  %s1935_s24 = sld [smem:[#allocation30_spill]]  ;;  %s1825_s18 = int_to_ptr.vmem [resolvable:$true] %s712_s18 }
 0x3f7   : > { %s693_s4 = scalar_lea.sflag [#allocation4], %s1751_s26  ;;  %s1334_s1 = scalar_lea.vmem %s1825_s18, 128 }
 0x3f8   : > { %p1335_p13 = scmp.ne.s32.totalorder %s1825_s18, %s1334_s1  ;;  %s1450_s27 = smov [#allocation13]  }
 0x3f9   : > { %s1338_s14 = sshll.u32 %s1450_s27, 4  ;;  %s1339_s14 = int_to_ptr.vmem [resolvable:$false] %s1338_s14 }
 0x3fa   : > { %p1336_p12 = pnand %p1335_p13, %p1934_p1  ;;  %s1340_s21 = scalar_lea.vmem %s1339_s14, 256 }
 0x3fb   : > { %p1341_p4 = scmp.lt.s32.totalorder %s1825_s18, %s1339_s14  ;;  %p1342_p9 = scmp.lt.s32.totalorder %s1340_s21, %s1334_s1 }
 0x3fc   : > { %s1936_s23 = smov %s1935_s24  ;;  %s1830_s6 = scalar_lea.hbm %s1935_s24, %s960_s30 }
 0x3fd   : > { %p1337_p2 = pneg %p1336_p12  ;;  %p1343_p7 = por %p1342_p9, %p1341_p4 }
 0x3ff   : > { %p1344_p5 = pnand %p1343_p7, %p1337_p2 }
 0x4ba   : > { %v683_v41 = vpop.f32.mrb[4].mxu1 }
 0x4bb   : > { %689 = vst [vmem:[%s454_s15] sm:$0xff] %v683_v41  ;;  %v1007_v42 = vpop.f32.mrb[5].mxu1 }
 0x4bc   : > { %v686_v43 = vpop.f32.mrb[6].mxu1 }
 0x4bd   : > { %1347 = shalt.err (!%p1344_p5)
}
 0x4be   : > { %s1348_s26 = scalar_lea.hbm %s1830_s6, 128  ;;  %s1352_s17 = scalar_lea.hbm %s1936_s23, 256 }
 0x4bf   : > { %p1349_p10 = scmp.ne.s32.totalorder %s1830_s6, %s1348_s26  ;;  %p1353_p6 = scmp.lt.u32.totalorder %s1830_s6, %s1936_s23 }
 0x4c0   : > { %p1354_p8 = scmp.lt.u32.totalorder %s1352_s17, %s1348_s26  ;;  %p1356_p13 = scmp.lt.u32.totalorder %s1348_s26, %s1830_s6 }
 0x4c1   : > { %p1350_p3 = pnand %p1349_p10, %p1934_p1 }
 0x4c2   : > { %p1355_p0 = por %p1354_p8, %p1353_p6 }
 0x4c3   : > { %p1351_p11 = pneg %p1350_p3 }
 0x4c4   : > { %p1357_p12 = por %p1356_p13, %p1355_p0 }
 0x4c6   : > { %p1358_p2 = pnand %p1357_p12, %p1351_p11 }
 0x4c8   : > { %1361 = shalt.err (!%p1358_p2)
}
 0x4c9   : > { %1025 = dma.vmem_to_hbm [thread:$0]  (%p1934_p1), %s1825_s18, 128, %s1830_s6, %s693_s4   ;;  %v1008_v44 = vpop.f32.mrb[7].mxu1 }
 0x4ca PF: > { %s1937_s8 = sld [smem:[#allocation23_spill]]  ;;  %s1938_s16 = sld [smem:[#allocation25_spill]] }
 0x4cb   : > { %p1940_p9 = scmp.ge.s32.totalorder %s1436_s29, 2 }
 0x4d0   : > { %s738_s13 = sand.u32 1, %s1937_s8   ;;  %p1939_p4 = scmp.ne.s32.totalorder %s1938_s16, 0 }
 0x4d1   : > { %s739_s15 = scalar_lea.sflag [#allocation4], %s738_s13 }
 0x4d2   : > { %p1050_p7 = pnand %p1940_p9, %p1939_p4 }
 0x4d4   : > { %1407 = dma.done.wait (!%p1050_p7), %s739_s15, 128  }
 0x4d5   : > { %1409 = vsyncadd (!%p1050_p7), %s739_s15, 4294967168  ;;  %s748_s30 = scalar_lea.sflag [#allocation15], %s738_s13 }
 0x4d6   : > { %1411 = dma.done.wait (!%p1050_p7), %s748_s30, 64  }
 0x4d7   : > { %1413 = vsyncadd (!%p1050_p7), %s748_s30, 4294967232  ;;  %s34_s29 = sadd.s32 1, %s1436_s29   ;;  %s1941_s19 = sld [smem:[#allocation24_spill]] }
 0x4d8   : > { %p31_p5 = scmp.ge.s32.totalorder %s34_s29, 4   ;;  %s1942_s26 = sld [smem:[#allocation27_spill]] }
 0x4d9   : > { %s1943_s18 = sld [smem:[#allocation26_spill]]  ;;  %s1944_s24 = smov %s1420_s25 }
 0x4da   : > { %s1946_s27 = smov %s1432_s28  ;;  %33 = sbr.rel (!%p31_p5) target bundleno = 17 (0x11), region = 151 }
 0x4dd   : > { %s1945_s25 = smov %s1941_s19 }
 0x4df   : > { %s1947_s28 = smov %s1943_s18 }
 0x4e1   :  { %753 = vsyncpa [#allocation3], 1 }
 0x4e2   :  { %755 = vsyncpa [#allocation3 + $0x1], 1 }
 0x4e3   :  { %756 = vsyncpa [#allocation6], 1 }
 0x4e4   :  { %758 = vsyncpa [#allocation6 + $0x1], 1 }
 0x4e5   :  { %759 = vsyncpa [#allocation9], 1 }
 0x4e6   :  { %761 = vsyncpa [#allocation9 + $0x1], 1 }
 0x4e7   :  { %762 = vsyncpa [#allocation12], 1 }
 0x4e8   :  { %763 = vsyncpa [#allocation4], 1 }
 0x4e9   :  { %765 = vsyncpa [#allocation4 + $0x1], 1 }
 0x4ea   :  { %766 = vsyncpa [#allocation15], 1 }
 0x4eb   :  { %768 = vsyncpa [#allocation15 + $0x1], 1 }

</bundles_post_ra>
